<compile_context>
chip_gen: v7x
topology: tpu7x:2x2x1
jax: 0.10.0
libtpu: 0.0.40
codegen_flags: <defaults>
</compile_context>

<pallas_src>
import functools

import jax
import jax.numpy as jnp
from jax.experimental import pallas as pl
from jax.experimental.pallas import tpu as pltpu


# ----------------------------------------------------------------------------
# helpers
# ----------------------------------------------------------------------------
def _full_spec(shape):
    """BlockSpec covering the whole array (single grid step)."""
    n = len(shape)
    return pl.BlockSpec(shape, lambda i, _n=n: (0,) * _n)


def _round_up(x, m):
    return (x + m - 1) // m * m


def _pick_tile(n, cap=256):
    """Largest HW tile: divisor of n, multiple of 8, <= cap (else full n)."""
    if n <= cap:
        return n
    for t in range(cap, 7, -1):
        if n % t == 0 and t % 8 == 0:
            return t
    return n


def im2col(x_nhwc, k=3, stride=2, pad=1):
    """3x3/stride-2 patches, channels-last.  Returns [B, Ho, Wo, k*k*C]."""
    B, H, W, C = x_nhwc.shape
    xp = jnp.pad(x_nhwc, ((0, 0), (pad, pad), (pad, pad), (0, 0)))
    Ho = (H + 2 * pad - k) // stride + 1
    Wo = (W + 2 * pad - k) // stride + 1
    patches = []
    for di in range(k):
        for dj in range(k):
            patches.append(
                xp[:, di:di + stride * Ho:stride, dj:dj + stride * Wo:stride, :])
    cols = jnp.concatenate(patches, axis=-1)
    return cols, Ho, Wo


# ----------------------------------------------------------------------------
# Image tower kernel: fused stem matmul + ReLU6 + global-avg-pool + projection
# Grid = (B, HW_tiles).  Pooled sum lives in a VMEM scratch accumulator
# (init at t==0, finalize + project at the last HW tile).
# ----------------------------------------------------------------------------
def image_tower_kernel(cols_ref, wc_ref, bc_ref, wp_ref, bp_ref, o_ref,
                       acc_ref, *, inv_hw):
    t = pl.program_id(1)

    @pl.when(t == 0)
    def _():
        acc_ref[...] = jnp.zeros_like(acc_ref)

    x = cols_ref[0]                                             # [TILE_HW, K_pad] bf16
    stem = jnp.dot(x, wc_ref[...],
                   preferred_element_type=jnp.float32) + bc_ref[...]
    stem = jnp.clip(stem, 0.0, 6.0)                             # ReLU6 (MobileNetV2)
    acc_ref[...] += jnp.sum(stem, axis=0, keepdims=True)        # partial GAP sum

    @pl.when(t == pl.num_programs(1) - 1)
    def _():
        pooled = (acc_ref[...] * inv_hw).astype(jnp.bfloat16)   # [1, C1]
        proj = jnp.dot(pooled, wp_ref[...],
                       preferred_element_type=jnp.float32) + bp_ref[...]
        o_ref[...] = proj.reshape(o_ref.shape)                  # [1, 1, 1280]


def image_tower(images_nchw, params):
    # TODO(synk): full MobileNetV2/ResNet50/ResNet101 backbone not reproduced;
    #             reduced to stem conv + ReLU6 + global pool + projection.
    x = jnp.transpose(images_nchw, (0, 2, 3, 1)).astype(jnp.float32)   # NHWC
    B = x.shape[0]
    cols, Ho, Wo = im2col(x, k=3, stride=2, pad=1)                     # [B,Ho,Wo,27]
    HW = Ho * Wo
    K = cols.shape[-1]
    K_pad = _round_up(K, 32)                                           # lane-friendlier K
    cols = jnp.pad(cols, ((0, 0), (0, 0), (0, 0), (0, K_pad - K)))
    cols = cols.reshape(B, HW, K_pad).astype(jnp.bfloat16)

    wc = jnp.pad(params["conv_w"], ((0, K_pad - K), (0, 0))).astype(jnp.bfloat16)
    bc = params["conv_b"]                                              # [1, C1] f32
    wp = params["img_proj_w"].astype(jnp.bfloat16)                     # [C1, 1280]
    bp = params["img_proj_b"]                                          # [1, 1280] f32
    C1, img_dim = wp.shape

    tile_hw = _pick_tile(HW)
    grid = (B, HW // tile_hw)

    out = pl.pallas_call(
        functools.partial(image_tower_kernel, inv_hw=1.0 / HW),
        out_shape=jax.ShapeDtypeStruct((B, 1, img_dim), jnp.float32),
        grid=grid,
        in_specs=[
            pl.BlockSpec((1, tile_hw, K_pad), lambda b, t: (b, t, 0)),
            pl.BlockSpec((K_pad, C1), lambda b, t: (0, 0)),
            pl.BlockSpec((1, C1), lambda b, t: (0, 0)),
            pl.BlockSpec((C1, img_dim), lambda b, t: (0, 0)),
            pl.BlockSpec((1, img_dim), lambda b, t: (0, 0)),
        ],
        out_specs=pl.BlockSpec((1, 1, img_dim), lambda b, t: (b, 0, 0)),
        scratch_shapes=[pltpu.VMEM((1, C1), jnp.float32)],
        compiler_params=pltpu.CompilerParams(
            dimension_semantics=("parallel", "arbitrary")),
    )(cols, wc, bc, wp, bp)
    return out.reshape(B, img_dim)


# ----------------------------------------------------------------------------
# Text tower kernel: fused-QKV self-attention block + residual + LayerNorm +
# masked mean pool + projection.  (Reduced stand-in for the BERT stack.)
# ----------------------------------------------------------------------------
def bert_text_kernel(x_ref, mask_ref, wqkv_ref, wo_ref, g_ref, beta_ref,
                     wp_ref, bp_ref, o_ref):
    B, S, H = x_ref.shape
    x = x_ref[...]                                              # [B, S, H] bf16
    m = mask_ref[...]                                           # [B, S]    f32

    # Fused Q/K/V projection on the flattened [B*S, H] input.
    x2 = x.reshape(B * S, H)
    qkv = jnp.dot(x2, wqkv_ref[...],
                  preferred_element_type=jnp.float32)           # [B*S, 3H]
    q = qkv[:, 0 * H:1 * H].reshape(B, S, H).astype(jnp.bfloat16)
    k = qkv[:, 1 * H:2 * H].reshape(B, S, H).astype(jnp.bfloat16)
    v = qkv[:, 2 * H:3 * H].reshape(B, S, H).astype(jnp.bfloat16)

    scale = 1.0 / float(H) ** 0.5
    scores = jnp.einsum("bqd,bkd->bqk", q, k,
                        preferred_element_type=jnp.float32) * scale
    scores = jnp.where(m[:, None, :] > 0.5, scores, jnp.float32(-1e30))

    s_max = jnp.max(scores, axis=-1, keepdims=True)
    e = jnp.exp(scores - s_max)
    p = e * pl.reciprocal(jnp.sum(e, axis=-1, keepdims=True), approx=True)

    ctx = jnp.einsum("bqk,bkd->bqd", p.astype(jnp.bfloat16), v,
                     preferred_element_type=jnp.float32)        # [B, S, H]
    attn = jnp.dot(ctx.reshape(B * S, H).astype(jnp.bfloat16), wo_ref[...],
                   preferred_element_type=jnp.float32)          # [B*S, H]

    h = x2.astype(jnp.float32) + attn                           # residual
    mu = jnp.mean(h, axis=-1, keepdims=True)                    # LayerNorm
    var = jnp.mean((h - mu) ** 2, axis=-1, keepdims=True)
    h = (h - mu) * jax.lax.rsqrt(var + 1e-12)
    h = h * g_ref[...] + beta_ref[...]
    h = h.reshape(B, S, H)

    denom = jnp.maximum(jnp.sum(m, axis=1, keepdims=True), 1.0)         # [B, 1]
    pooled = jnp.sum(h * m[:, :, None], axis=1) * pl.reciprocal(denom, approx=True)

    o_ref[...] = jnp.dot(pooled.astype(jnp.bfloat16), wp_ref[...],
                         preferred_element_type=jnp.float32) + bp_ref[...]


def text_tower(text, text_length, attention_mask, params):
    # TODO(synk): 12-layer BERT encoder not reproduced; reduced to one fused
    #             attention block.  text_length is unused in the BERT-only
    #             variant (attention_mask carries the padding info).
    del text_length
    emb = params["tok_emb"][text] + params["pos_emb"][None, :, :]       # gather in XLA
    emb = emb.astype(jnp.bfloat16)                                      # [B, S, H]
    mask = attention_mask.astype(jnp.float32)                           # [B, S]

    wqkv = jnp.concatenate(
        [params["wq"], params["wk"], params["wv"]], axis=1).astype(jnp.bfloat16)
    wo = params["wo"].astype(jnp.bfloat16)
    wp = params["txt_proj_w"].astype(jnp.bfloat16)
    B = emb.shape[0]
    text_dim = wp.shape[1]

    arrays = (emb, mask, wqkv, wo, params["ln_g"], params["ln_b"],
              wp, params["txt_proj_b"])
    out_shape = jax.ShapeDtypeStruct((B, text_dim), jnp.float32)
    return pl.pallas_call(
        bert_text_kernel,
        out_shape=out_shape,
        grid=(1,),
        in_specs=[_full_spec(a.shape) for a in arrays],
        out_specs=_full_spec(out_shape.shape),
    )(*arrays)


# ----------------------------------------------------------------------------
# Parameters & forward (mirrors ModelBertOnly.forward)
# ----------------------------------------------------------------------------
def make_params(key, *, in_ch=3, stem_ch=32, img_dim=1280,
                vocab=100, seq=8, hidden=128, text_dim=128):
    ks = jax.random.split(key, 12)
    s = 0.05
    p = {
        # image tower (reduced MobileNetV2: 3x3/2 stem -> ReLU6 -> GAP -> FC)
        "conv_w": jax.random.normal(ks[0], (3 * 3 * in_ch, stem_ch)) * s,
        "conv_b": jax.random.normal(ks[1], (1, stem_ch)) * s,
        "img_proj_w": jax.random.normal(ks[2], (stem_ch, img_dim)) * s,
        "img_proj_b": jax.random.normal(ks[3], (1, img_dim)) * s,
        # text tower (reduced BERT: emb + 1 attention block + pool + FC)
        "tok_emb": jax.random.normal(ks[4], (vocab, hidden)) * s,
        "pos_emb": jax.random.normal(ks[5], (seq, hidden)) * s,
        "wq": jax.random.normal(ks[6], (hidden, hidden)) * s,
        "wk": jax.random.normal(ks[7], (hidden, hidden)) * s,
        "wv": jax.random.normal(ks[8], (hidden, hidden)) * s,
        "wo": jax.random.normal(ks[9], (hidden, hidden)) * s,
        "ln_g": jnp.ones((1, hidden), jnp.float32),
        "ln_b": jnp.zeros((1, hidden), jnp.float32),
        "txt_proj_w": jax.random.normal(ks[10], (hidden, text_dim)) * s,
        "txt_proj_b": jax.random.normal(ks[11], (1, text_dim)) * s,
    }
    return jax.tree.map(lambda a: a.astype(jnp.float32), p)


@jax.jit
def model_bert_only_forward(images_nchw, text, text_length, attention_mask,
                            params):
    image_embeddings = image_tower(images_nchw, params)
    text_embeddings = text_tower(text, text_length, attention_mask, params)
    return image_embeddings, text_embeddings


# ----------------------------------------------------------------------------
if __name__ == "__main__":
    key = jax.random.PRNGKey(0)
    k_img, k_txt, k_par = jax.random.split(key, 3)

    B, C, HW, S, VOCAB = 2, 3, 16, 8, 100
    images = jax.random.normal(k_img, (B, C, HW, HW), jnp.float32)     # NCHW
    text = jax.random.randint(k_txt, (B, S), 0, VOCAB, jnp.int32)
    text_length = jnp.array([S, 5], jnp.int32)
    attention_mask = (jnp.arange(S)[None, :] < text_length[:, None]).astype(
        jnp.int32)

    params = make_params(k_par, in_ch=C, seq=S, vocab=VOCAB)

    img_emb, txt_emb = model_bert_only_forward(
        images, text, text_length, attention_mask, params)
    jax.block_until_ready((img_emb, txt_emb))

    assert img_emb.shape == (B, 1280), img_emb.shape
    assert txt_emb.shape == (B, 128), txt_emb.shape
    assert bool(jnp.all(jnp.isfinite(img_emb))) and bool(jnp.all(jnp.isfinite(txt_emb)))
    print("KERNEL_OK")
</pallas_src>

<mosaic_0001>
module attributes {stable_mosaic.version = 11 : i64} {
  func.func @image_tower_kernel(%arg0: i32, %arg1: i32, %arg2: memref<1x64x32xbf16, #tpu.memory_space<vmem>>, %arg3: memref<32x32xbf16, #tpu.memory_space<vmem>>, %arg4: memref<1x32xf32, #tpu.memory_space<vmem>>, %arg5: memref<32x1280xbf16, #tpu.memory_space<vmem>>, %arg6: memref<1x1280xf32, #tpu.memory_space<vmem>>, %arg7: memref<1x1x1280xf32, #tpu.memory_space<vmem>>, %arg8: memref<1x32xf32, #tpu.memory_space<vmem>>) attributes {dimension_semantics = [#tpu.dimension_semantics<parallel>, #tpu.dimension_semantics<arbitrary>], iteration_bounds = array<i64: 2, 1>, scalar_prefetch = 0 : i64, scratch_operands = 1 : i64, tpu.core_type = #tpu.core_type<tc>, window_params = [{transform_indices = @transform_0, window_bounds = array<i64: 1, 64, 32>}, {pipeline_mode = #tpu.pipeline_mode<synchronous>, transform_indices = @transform_1, window_bounds = array<i64: 32, 32>}, {pipeline_mode = #tpu.pipeline_mode<synchronous>, transform_indices = @transform_2, window_bounds = array<i64: 1, 32>}, {pipeline_mode = #tpu.pipeline_mode<synchronous>, transform_indices = @transform_3, window_bounds = array<i64: 32, 1280>}, {pipeline_mode = #tpu.pipeline_mode<synchronous>, transform_indices = @transform_4, window_bounds = array<i64: 1, 1280>}, {transform_indices = @transform_5, window_bounds = array<i64: 1, 1, 1280>}]} {
    %c0_i32 = arith.constant 0 : i32
    %0 = arith.cmpi eq, %arg1, %c0_i32 : i32
    %1 = arith.extui %0 : i1 to i32
    %c0_i32_0 = arith.constant 0 : i32
    %2 = arith.cmpi ne, %1, %c0_i32_0 : i32
    scf.if %2 {
      %cst_16 = arith.constant 0.000000e+00 : f32
      %22 = vector.broadcast %cst_16 : f32 to vector<1x32xf32>
      %c0_17 = arith.constant 0 : index
      %c0_18 = arith.constant 0 : index
      %23 = vector.load %arg8[%c0_17, %c0_18] : memref<1x32xf32, #tpu.memory_space<vmem>>, vector<1x32xf32>
      tpu.vector_store %arg8[%c0_17, %c0_18], %22 {strides = array<i32>} : memref<1x32xf32, #tpu.memory_space<vmem>>, vector<1x32xf32>,
    } else {
    }
    %c0 = arith.constant 0 : index
    %c0_1 = arith.constant 0 : index
    %c0_2 = arith.constant 0 : index
    %3 = vector.load %arg2[%c0, %c0_1, %c0_2] : memref<1x64x32xbf16, #tpu.memory_space<vmem>>, vector<1x64x32xbf16>
    %4 = vector.shape_cast %3 : vector<1x64x32xbf16> to vector<64x32xbf16>
    %c0_3 = arith.constant 0 : index
    %c0_4 = arith.constant 0 : index
    %5 = vector.load %arg3[%c0_3, %c0_4] : memref<32x32xbf16, #tpu.memory_space<vmem>>, vector<32x32xbf16>
    %cst = arith.constant dense<0.000000e+00> : vector<64x32xf32>
    %6 = tpu.matmul %4, %5, %cst {dimension_numbers = #tpu.dot_dimension_numbers<[1], [0], [0], [1], [0, 0, 1, 1], [], []>} : vector<64x32xbf16>, vector<32x32xbf16>, vector<64x32xf32> -> vector<64x32xf32>
    %c0_5 = arith.constant 0 : index
    %c0_6 = arith.constant 0 : index
    %7 = vector.load %arg4[%c0_5, %c0_6] : memref<1x32xf32, #tpu.memory_space<vmem>>, vector<1x32xf32>
    %8 = vector.broadcast %7 : vector<1x32xf32> to vector<64x32xf32>
    %9 = arith.addf %6, %8 : vector<64x32xf32>
    %cst_7 = arith.constant 0.000000e+00 : f32
    %cst_8 = arith.constant 6.000000e+00 : f32
    %10 = vector.broadcast %cst_7 : f32 to vector<64x32xf32>
    %11 = arith.maximumf %10, %9 : vector<64x32xf32>
    %12 = vector.broadcast %cst_8 : f32 to vector<64x32xf32>
    %13 = arith.minimumf %12, %11 : vector<64x32xf32>
    %c0_9 = arith.constant 0 : index
    %c0_10 = arith.constant 0 : index
    %14 = vector.load %arg8[%c0_9, %c0_10] : memref<1x32xf32, #tpu.memory_space<vmem>>, vector<1x32xf32>
    %cst_11 = arith.constant dense<0.000000e+00> : vector<32xf32>
    %15 = vector.multi_reduction <add>, %13, %cst_11 [0] : vector<64x32xf32> to vector<32xf32>
    %16 = vector.shape_cast %15 : vector<32xf32> to vector<1x32xf32>
    %17 = arith.addf %14, %16 : vector<1x32xf32>
    %c0_12 = arith.constant 0 : index
    %c0_13 = arith.constant 0 : index
    %18 = vector.load %arg8[%c0_12, %c0_13] : memref<1x32xf32, #tpu.memory_space<vmem>>, vector<1x32xf32>
    tpu.vector_store %arg8[%c0_12, %c0_13], %17 {strides = array<i32>} : memref<1x32xf32, #tpu.memory_space<vmem>>, vector<1x32xf32>,
    %c0_i32_14 = arith.constant 0 : i32
    %19 = arith.cmpi eq, %arg1, %c0_i32_14 : i32
    %20 = arith.extui %19 : i1 to i32
    %c0_i32_15 = arith.constant 0 : i32
    %21 = arith.cmpi ne, %20, %c0_i32_15 : i32
    scf.if %21 {
      %c0_16 = arith.constant 0 : index
      %c0_17 = arith.constant 0 : index
      %22 = vector.load %arg8[%c0_16, %c0_17] : memref<1x32xf32, #tpu.memory_space<vmem>>, vector<1x32xf32>
      %cst_18 = arith.constant 1.562500e-02 : f32
      %23 = vector.broadcast %cst_18 : f32 to vector<1x32xf32>
      %24 = arith.mulf %22, %23 : vector<1x32xf32>
      %25 = arith.truncf %24 : vector<1x32xf32> to vector<1x32xbf16>
      %c0_19 = arith.constant 0 : index
      %c0_20 = arith.constant 0 : index
      %26 = vector.load %arg5[%c0_19, %c0_20] : memref<32x1280xbf16, #tpu.memory_space<vmem>>, vector<32x1280xbf16>
      %cst_21 = arith.constant dense<0.000000e+00> : vector<1x1280xf32>
      %27 = tpu.matmul %25, %26, %cst_21 {dimension_numbers = #tpu.dot_dimension_numbers<[1], [0], [0], [1], [0, 0, 1, 1], [], []>} : vector<1x32xbf16>, vector<32x1280xbf16>, vector<1x1280xf32> -> vector<1x1280xf32>
      %c0_22 = arith.constant 0 : index
      %c0_23 = arith.constant 0 : index
      %28 = vector.load %arg6[%c0_22, %c0_23] : memref<1x1280xf32, #tpu.memory_space<vmem>>, vector<1x1280xf32>
      %29 = arith.addf %27, %28 : vector<1x1280xf32>
      %30 = vector.shape_cast %29 : vector<1x1280xf32> to vector<1x1x1280xf32>
      %c0_24 = arith.constant 0 : index
      %c0_25 = arith.constant 0 : index
      %c0_26 = arith.constant 0 : index
      %31 = vector.load %arg7[%c0_24, %c0_25, %c0_26] : memref<1x1x1280xf32, #tpu.memory_space<vmem>>, vector<1x1x1280xf32>
      tpu.vector_store %arg7[%c0_24, %c0_25, %c0_26], %30 {strides = array<i32>} : memref<1x1x1280xf32, #tpu.memory_space<vmem>>, vector<1x1x1280xf32>,
    } else {
    }
    return
  }
  func.func @transform_0(%arg0: i32, %arg1: i32) -> (i32, i32, i32) {
    %c0_i32 = arith.constant 0 : i32
    %c0_i32_0 = arith.constant 0 : i32
    return %arg0, %arg1, %c0_i32 : i32, i32, i32
  }
  func.func @transform_1(%arg0: i32, %arg1: i32) -> (i32, i32) {
    %c0_i32 = arith.constant 0 : i32
    %c0_i32_0 = arith.constant 0 : i32
    %c0_i32_1 = arith.constant 0 : i32
    return %c0_i32, %c0_i32_0 : i32, i32
  }
  func.func @transform_2(%arg0: i32, %arg1: i32) -> (i32, i32) {
    %c0_i32 = arith.constant 0 : i32
    %c0_i32_0 = arith.constant 0 : i32
    %c0_i32_1 = arith.constant 0 : i32
    return %c0_i32, %c0_i32_0 : i32, i32
  }
  func.func @transform_3(%arg0: i32, %arg1: i32) -> (i32, i32) {
    %c0_i32 = arith.constant 0 : i32
    %c0_i32_0 = arith.constant 0 : i32
    %c0_i32_1 = arith.constant 0 : i32
    return %c0_i32, %c0_i32_0 : i32, i32
  }
  func.func @transform_4(%arg0: i32, %arg1: i32) -> (i32, i32) {
    %c0_i32 = arith.constant 0 : i32
    %c0_i32_0 = arith.constant 0 : i32
    %c0_i32_1 = arith.constant 0 : i32
    return %c0_i32, %c0_i32_0 : i32, i32
  }
  func.func @transform_5(%arg0: i32, %arg1: i32) -> (i32, i32, i32) {
    %c0_i32 = arith.constant 0 : i32
    %c0_i32_0 = arith.constant 0 : i32
    %c0_i32_1 = arith.constant 0 : i32
    return %arg0, %c0_i32, %c0_i32_0 : i32, i32, i32
  }
}

module attributes {stable_mosaic.version = 11 : i64} {
  func.func @bert_text_kernel(%arg0: i32, %arg1: memref<2x8x128xbf16, #tpu.memory_space<vmem>>, %arg2: memref<2x8xf32, #tpu.memory_space<vmem>>, %arg3: memref<128x384xbf16, #tpu.memory_space<vmem>>, %arg4: memref<128x128xbf16, #tpu.memory_space<vmem>>, %arg5: memref<1x128xf32, #tpu.memory_space<vmem>>, %arg6: memref<1x128xf32, #tpu.memory_space<vmem>>, %arg7: memref<128x128xbf16, #tpu.memory_space<vmem>>, %arg8: memref<1x128xf32, #tpu.memory_space<vmem>>, %arg9: memref<2x128xf32, #tpu.memory_space<vmem>>) attributes {dimension_semantics = [#tpu.dimension_semantics<arbitrary>], iteration_bounds = array<i64: 1>, scalar_prefetch = 0 : i64, scratch_operands = 0 : i64, tpu.core_type = #tpu.core_type<tc>, window_params = [{pipeline_mode = #tpu.pipeline_mode<synchronous>, transform_indices = @transform_0, window_bounds = array<i64: 2, 8, 128>}, {pipeline_mode = #tpu.pipeline_mode<synchronous>, transform_indices = @transform_1, window_bounds = array<i64: 2, 8>}, {pipeline_mode = #tpu.pipeline_mode<synchronous>, transform_indices = @transform_2, window_bounds = array<i64: 128, 384>}, {pipeline_mode = #tpu.pipeline_mode<synchronous>, transform_indices = @transform_3, window_bounds = array<i64: 128, 128>}, {pipeline_mode = #tpu.pipeline_mode<synchronous>, transform_indices = @transform_4, window_bounds = array<i64: 1, 128>}, {pipeline_mode = #tpu.pipeline_mode<synchronous>, transform_indices = @transform_5, window_bounds = array<i64: 1, 128>}, {pipeline_mode = #tpu.pipeline_mode<synchronous>, transform_indices = @transform_6, window_bounds = array<i64: 128, 128>}, {pipeline_mode = #tpu.pipeline_mode<synchronous>, transform_indices = @transform_7, window_bounds = array<i64: 1, 128>}, {pipeline_mode = #tpu.pipeline_mode<synchronous>, transform_indices = @transform_8, window_bounds = array<i64: 2, 128>}]} {
    %c0 = arith.constant 0 : index
    %c0_0 = arith.constant 0 : index
    %c0_1 = arith.constant 0 : index
    %0 = vector.load %arg1[%c0, %c0_0, %c0_1] : memref<2x8x128xbf16, #tpu.memory_space<vmem>>, vector<2x8x128xbf16>
    %c0_2 = arith.constant 0 : index
    %c0_3 = arith.constant 0 : index
    %1 = vector.load %arg2[%c0_2, %c0_3] : memref<2x8xf32, #tpu.memory_space<vmem>>, vector<2x8xf32>
    %2 = vector.shape_cast %0 : vector<2x8x128xbf16> to vector<16x128xbf16>
    %c0_4 = arith.constant 0 : index
    %c0_5 = arith.constant 0 : index
    %3 = vector.load %arg3[%c0_4, %c0_5] : memref<128x384xbf16, #tpu.memory_space<vmem>>, vector<128x384xbf16>
    %cst = arith.constant dense<0.000000e+00> : vector<16x384xf32>
    %4 = tpu.matmul %2, %3, %cst {dimension_numbers = #tpu.dot_dimension_numbers<[1], [0], [0], [1], [0, 0, 1, 1], [], []>} : vector<16x128xbf16>, vector<128x384xbf16>, vector<16x384xf32> -> vector<16x384xf32>
    %5 = vector.extract_strided_slice %4 {offsets = [0, 0], sizes = [16, 128], strides = [1, 1]} : vector<16x384xf32> to vector<16x128xf32>
    %6 = vector.shape_cast %5 : vector<16x128xf32> to vector<2x8x128xf32>
    %7 = arith.truncf %6 : vector<2x8x128xf32> to vector<2x8x128xbf16>
    %8 = vector.extract_strided_slice %4 {offsets = [0, 128], sizes = [16, 128], strides = [1, 1]} : vector<16x384xf32> to vector<16x128xf32>
    %9 = vector.shape_cast %8 : vector<16x128xf32> to vector<2x8x128xf32>
    %10 = arith.truncf %9 : vector<2x8x128xf32> to vector<2x8x128xbf16>
    %11 = vector.extract_strided_slice %4 {offsets = [0, 256], sizes = [16, 128], strides = [1, 1]} : vector<16x384xf32> to vector<16x128xf32>
    %12 = vector.shape_cast %11 : vector<16x128xf32> to vector<2x8x128xf32>
    %13 = arith.truncf %12 : vector<2x8x128xf32> to vector<2x8x128xbf16>
    "tpu.trace_start"() <{level = 10 : i32, message = "bqd,bkd->bqk"}> : () -> ()
    %cst_6 = arith.constant dense<0.000000e+00> : vector<2x8x8xf32>
    %14 = tpu.matmul %7, %10, %cst_6 {dimension_numbers = #tpu.dot_dimension_numbers<[2], [2], [1], [1], [0, 0, 0, 1, 1, 1], [0], [0]>} : vector<2x8x128xbf16>, vector<2x8x128xbf16>, vector<2x8x8xf32> -> vector<2x8x8xf32>
    "tpu.trace_stop"() : () -> ()
    %cst_7 = arith.constant 0.0883883461 : f32
    %15 = vector.broadcast %cst_7 : f32 to vector<2x8x8xf32>
    %16 = arith.mulf %14, %15 : vector<2x8x8xf32>
    %17 = vector.shape_cast %1 : vector<2x8xf32> to vector<2x1x8xf32>
    %cst_8 = arith.constant 5.000000e-01 : f32
    %18 = vector.broadcast %cst_8 : f32 to vector<2x1x8xf32>
    %19 = arith.cmpf ogt, %17, %18 : vector<2x1x8xf32>
    %cst_9 = arith.constant -1.000000e+30 : f32
    %20 = vector.shape_cast %19 : vector<2x1x8xi1> to vector<2x1x8xi1>
    %21 = vector.broadcast %20 : vector<2x1x8xi1> to vector<2x8x8xi1>
    %22 = vector.broadcast %cst_9 : f32 to vector<2x8x8xf32>
    %23 = arith.select %21, %16, %22 : vector<2x8x8xi1>, vector<2x8x8xf32>
    %cst_10 = arith.constant dense<0xFF800000> : vector<2x8xf32>
    %24 = vector.multi_reduction <maximumf>, %23, %cst_10 [2] : vector<2x8x8xf32> to vector<2x8xf32>
    %25 = vector.shape_cast %24 : vector<2x8xf32> to vector<2x8x1xf32>
    %26 = vector.broadcast %25 : vector<2x8x1xf32> to vector<2x8x8xf32>
    %27 = arith.subf %23, %26 : vector<2x8x8xf32>
    %28 = math.exp %27 : vector<2x8x8xf32>
    %cst_11 = arith.constant dense<0.000000e+00> : vector<2x8xf32>
    %29 = vector.multi_reduction <add>, %28, %cst_11 [2] : vector<2x8x8xf32> to vector<2x8xf32>
    %30 = vector.shape_cast %29 : vector<2x8xf32> to vector<2x8x1xf32>
    %31 = tpu.reciprocal %30 {approx = true} : vector<2x8x1xf32> -> vector<2x8x1xf32>
    %32 = vector.broadcast %31 : vector<2x8x1xf32> to vector<2x8x8xf32>
    %33 = arith.mulf %28, %32 : vector<2x8x8xf32>
    %34 = arith.truncf %33 : vector<2x8x8xf32> to vector<2x8x8xbf16>
    "tpu.trace_start"() <{level = 10 : i32, message = "bqk,bkd->bqd"}> : () -> ()
    %cst_12 = arith.constant dense<0.000000e+00> : vector<2x8x128xf32>
    %35 = tpu.matmul %34, %13, %cst_12 {dimension_numbers = #tpu.dot_dimension_numbers<[2], [1], [1], [2], [0, 0, 0, 1, 1, 2], [0], [0]>} : vector<2x8x8xbf16>, vector<2x8x128xbf16>, vector<2x8x128xf32> -> vector<2x8x128xf32>
    "tpu.trace_stop"() : () -> ()
    %36 = vector.shape_cast %35 : vector<2x8x128xf32> to vector<16x128xf32>
    %37 = arith.truncf %36 : vector<16x128xf32> to vector<16x128xbf16>
    %c0_13 = arith.constant 0 : index
    %c0_14 = arith.constant 0 : index
    %38 = vector.load %arg4[%c0_13, %c0_14] : memref<128x128xbf16, #tpu.memory_space<vmem>>, vector<128x128xbf16>
    %cst_15 = arith.constant dense<0.000000e+00> : vector<16x128xf32>
    %39 = tpu.matmul %37, %38, %cst_15 {dimension_numbers = #tpu.dot_dimension_numbers<[1], [0], [0], [1], [0, 0, 1, 1], [], []>} : vector<16x128xbf16>, vector<128x128xbf16>, vector<16x128xf32> -> vector<16x128xf32>
    %40 = arith.extf %2 : vector<16x128xbf16> to vector<16x128xf32>
    %41 = arith.addf %40, %39 : vector<16x128xf32>
    %cst_16 = arith.constant dense<0.000000e+00> : vector<16xf32>
    %42 = vector.multi_reduction <add>, %41, %cst_16 [1] : vector<16x128xf32> to vector<16xf32>
    %43 = vector.shape_cast %42 : vector<16xf32> to vector<16x1xf32>
    %cst_17 = arith.constant 1.280000e+02 : f32
    %44 = vector.broadcast %cst_17 : f32 to vector<16x1xf32>
    %45 = arith.divf %43, %44 : vector<16x1xf32>
    %46 = vector.broadcast %45 : vector<16x1xf32> to vector<16x128xf32>
    %47 = arith.subf %41, %46 : vector<16x128xf32>
    %48 = arith.mulf %47, %47 : vector<16x128xf32>
    %cst_18 = arith.constant dense<0.000000e+00> : vector<16xf32>
    %49 = vector.multi_reduction <add>, %48, %cst_18 [1] : vector<16x128xf32> to vector<16xf32>
    %50 = vector.shape_cast %49 : vector<16xf32> to vector<16x1xf32>
    %cst_19 = arith.constant 1.280000e+02 : f32
    %51 = vector.broadcast %cst_19 : f32 to vector<16x1xf32>
    %52 = arith.divf %50, %51 : vector<16x1xf32>
    %53 = vector.broadcast %45 : vector<16x1xf32> to vector<16x128xf32>
    %54 = arith.subf %41, %53 : vector<16x128xf32>
    %cst_20 = arith.constant 9.99999996E-13 : f32
    %55 = vector.broadcast %cst_20 : f32 to vector<16x1xf32>
    %56 = arith.addf %52, %55 : vector<16x1xf32>
    %57 = math.rsqrt %56 : vector<16x1xf32>
    %58 = vector.broadcast %57 : vector<16x1xf32> to vector<16x128xf32>
    %59 = arith.mulf %54, %58 : vector<16x128xf32>
    %c0_21 = arith.constant 0 : index
    %c0_22 = arith.constant 0 : index
    %60 = vector.load %arg5[%c0_21, %c0_22] : memref<1x128xf32, #tpu.memory_space<vmem>>, vector<1x128xf32>
    %61 = vector.broadcast %60 : vector<1x128xf32> to vector<16x128xf32>
    %62 = arith.mulf %59, %61 : vector<16x128xf32>
    %c0_23 = arith.constant 0 : index
    %c0_24 = arith.constant 0 : index
    %63 = vector.load %arg6[%c0_23, %c0_24] : memref<1x128xf32, #tpu.memory_space<vmem>>, vector<1x128xf32>
    %64 = vector.broadcast %63 : vector<1x128xf32> to vector<16x128xf32>
    %65 = arith.addf %62, %64 : vector<16x128xf32>
    %66 = vector.shape_cast %65 : vector<16x128xf32> to vector<2x8x128xf32>
    %cst_25 = arith.constant dense<0.000000e+00> : vector<2xf32>
    %67 = vector.multi_reduction <add>, %1, %cst_25 [1] : vector<2x8xf32> to vector<2xf32>
    %68 = vector.shape_cast %67 : vector<2xf32> to vector<2x1xf32>
    %cst_26 = arith.constant 1.000000e+00 : f32
    %69 = vector.broadcast %cst_26 : f32 to vector<2x1xf32>
    %70 = arith.maximumf %68, %69 : vector<2x1xf32>
    %71 = vector.shape_cast %1 : vector<2x8xf32> to vector<2x8x1xf32>
    %72 = vector.broadcast %71 : vector<2x8x1xf32> to vector<2x8x128xf32>
    %73 = arith.mulf %66, %72 : vector<2x8x128xf32>
    %cst_27 = arith.constant dense<0.000000e+00> : vector<2x128xf32>
    %74 = vector.multi_reduction <add>, %73, %cst_27 [1] : vector<2x8x128xf32> to vector<2x128xf32>
    %75 = tpu.reciprocal %70 {approx = true} : vector<2x1xf32> -> vector<2x1xf32>
    %76 = vector.broadcast %75 : vector<2x1xf32> to vector<2x128xf32>
    %77 = arith.mulf %74, %76 : vector<2x128xf32>
    %78 = arith.truncf %77 : vector<2x128xf32> to vector<2x128xbf16>
    %c0_28 = arith.constant 0 : index
    %c0_29 = arith.constant 0 : index
    %79 = vector.load %arg7[%c0_28, %c0_29] : memref<128x128xbf16, #tpu.memory_space<vmem>>, vector<128x128xbf16>
    %cst_30 = arith.constant dense<0.000000e+00> : vector<2x128xf32>
    %80 = tpu.matmul %78, %79, %cst_30 {dimension_numbers = #tpu.dot_dimension_numbers<[1], [0], [0], [1], [0, 0, 1, 1], [], []>} : vector<2x128xbf16>, vector<128x128xbf16>, vector<2x128xf32> -> vector<2x128xf32>
    %c0_31 = arith.constant 0 : index
    %c0_32 = arith.constant 0 : index
    %81 = vector.load %arg8[%c0_31, %c0_32] : memref<1x128xf32, #tpu.memory_space<vmem>>, vector<1x128xf32>
    %82 = vector.broadcast %81 : vector<1x128xf32> to vector<2x128xf32>
    %83 = arith.addf %80, %82 : vector<2x128xf32>
    %c0_33 = arith.constant 0 : index
    %c0_34 = arith.constant 0 : index
    %84 = vector.load %arg9[%c0_33, %c0_34] : memref<2x128xf32, #tpu.memory_space<vmem>>, vector<2x128xf32>
    tpu.vector_store %arg9[%c0_33, %c0_34], %83 {strides = array<i32>} : memref<2x128xf32, #tpu.memory_space<vmem>>, vector<2x128xf32>,
    return
  }
  func.func @transform_0(%arg0: i32) -> (i32, i32, i32) {
    %c0_i32 = arith.constant 0 : i32
    %c0_i32_0 = arith.constant 0 : i32
    %c0_i32_1 = arith.constant 0 : i32
    %c0_i32_2 = arith.constant 0 : i32
    return %c0_i32, %c0_i32_0, %c0_i32_1 : i32, i32, i32
  }
  func.func @transform_1(%arg0: i32) -> (i32, i32) {
    %c0_i32 = arith.constant 0 : i32
    %c0_i32_0 = arith.constant 0 : i32
    %c0_i32_1 = arith.constant 0 : i32
    return %c0_i32, %c0_i32_0 : i32, i32
  }
  func.func @transform_2(%arg0: i32) -> (i32, i32) {
    %c0_i32 = arith.constant 0 : i32
    %c0_i32_0 = arith.constant 0 : i32
    %c0_i32_1 = arith.constant 0 : i32
    return %c0_i32, %c0_i32_0 : i32, i32
  }
  func.func @transform_3(%arg0: i32) -> (i32, i32) {
    %c0_i32 = arith.constant 0 : i32
    %c0_i32_0 = arith.constant 0 : i32
    %c0_i32_1 = arith.constant 0 : i32
    return %c0_i32, %c0_i32_0 : i32, i32
  }
  func.func @transform_4(%arg0: i32) -> (i32, i32) {
    %c0_i32 = arith.constant 0 : i32
    %c0_i32_0 = arith.constant 0 : i32
    %c0_i32_1 = arith.constant 0 : i32
    return %c0_i32, %c0_i32_0 : i32, i32
  }
  func.func @transform_5(%arg0: i32) -> (i32, i32) {
    %c0_i32 = arith.constant 0 : i32
    %c0_i32_0 = arith.constant 0 : i32
    %c0_i32_1 = arith.constant 0 : i32
    return %c0_i32, %c0_i32_0 : i32, i32
  }
  func.func @transform_6(%arg0: i32) -> (i32, i32) {
    %c0_i32 = arith.constant 0 : i32
    %c0_i32_0 = arith.constant 0 : i32
    %c0_i32_1 = arith.constant 0 : i32
    return %c0_i32, %c0_i32_0 : i32, i32
  }
  func.func @transform_7(%arg0: i32) -> (i32, i32) {
    %c0_i32 = arith.constant 0 : i32
    %c0_i32_0 = arith.constant 0 : i32
    %c0_i32_1 = arith.constant 0 : i32
    return %c0_i32, %c0_i32_0 : i32, i32
  }
  func.func @transform_8(%arg0: i32) -> (i32, i32) {
    %c0_i32 = arith.constant 0 : i32
    %c0_i32_0 = arith.constant 0 : i32
    %c0_i32_1 = arith.constant 0 : i32
    return %c0_i32, %c0_i32_0 : i32, i32
  }
}

</mosaic_0001>

<bundles_post_ra>
// kernel: model_bert_only_forward.3
= control target key start
LH: loop header
LB: loop body
LE: loop exit
PB: predicated region body
PF: predicated region fallthrough
CT: control target
= control target key end

     0   :  { %v1117_v2 = vmov 0   ;;  %v1118_v3 = vmov 0.0   ;;  %s1387_s0 = inlined_call_operand.vmem [shape: bf16[2,8,128], index: 0, kind: input, shape index: {}]   ;;  %s1388_s1 = inlined_call_operand.vmem [shape: f32[2,8], index: 1, kind: input, shape index: {}]   ;;  %s1389_s2 = inlined_call_operand.vmem [shape: bf16[128,384], index: 2, kind: input, shape index: {}]   ;;  %s1390_s3 = inlined_call_operand.vmem [shape: bf16[128,128], index: 3, kind: input, shape index: {}]   ;;  %s1391_s4 = inlined_call_operand.vmem [shape: f32[1,128], index: 4, kind: input, shape index: {}]   ;;  %s1392_s5 = inlined_call_operand.vmem [shape: f32[1,128], index: 5, kind: input, shape index: {}]   ;;  %s1393_s6 = inlined_call_operand.vmem [shape: bf16[128,128], index: 6, kind: input, shape index: {}]   ;;  %s1394_s7 = inlined_call_operand.vmem [shape: f32[1,128], index: 7, kind: input, shape index: {}]   ;;  %s1395_s8 = inlined_call_operand.hbm [shape: f32[2,128], index: 8, kind: output, shape index: {}]  }
   0x1   :  { %v1029_v0 = vld [vmem:[%s1389_s2 + $0x4] ss:$12 sps:$4 sm:$0xff]   ;;  %v1031_v1 = vld [vmem:[%s1389_s2] ss:$12 sps:$4 sm:$0xff]   ;;  %232 = vmatprep.mubr.bf16.mxu0 %v1117_v2  ;;  %940 = vmatprep.subr.bf16.mxu1 %v1118_v3  ;;  %v1032_v4 = vld [vmem:[%s1389_s2 + $0x1c] ss:$12 sps:$4 sm:$0xff]  }
   0x2   :  { %200 = vmatprep.subr.bf16.mxu0 %v1029_v0  ;;  %v1034_v5 = vld [vmem:[%s1389_s2 + $0x18] ss:$12 sps:$4 sm:$0xff]   ;;  %v1035_v6 = vld [vmem:[%s1389_s2 + $0x34] ss:$12 sps:$4 sm:$0xff]   ;;  %v1037_v7 = vld [vmem:[%s1389_s2 + $0x30] ss:$12 sps:$4 sm:$0xff]  }
   0x3   :  { %201 = vmatpush1.bf16.msra.mxu0 %v1031_v1  ;;  %v1038_v8 = vld [vmem:[%s1389_s2 + $0x4c] ss:$12 sps:$4 sm:$0xff]   ;;  %v1040_v9 = vld [vmem:[%s1389_s2 + $0x48] ss:$12 sps:$4 sm:$0xff]   ;;  %v1041_v11 = vld [vmem:[%s1389_s2 + $0x64] ss:$12 sps:$4 sm:$0xff]  }
   0x4   :  { %202 = vmatprep.subr.bf16.mxu0 %v1032_v4  ;;  %v1054_v10 = vld [vmem:[%s1389_s2 + $0x8] ss:$12 sps:$4 sm:$0xff]   ;;  %v1055_v12 = vld [vmem:[%s1389_s2 + $0x20] ss:$12 sps:$4 sm:$0xff]   ;;  %v1046_v15 = vld [vmem:[%s1389_s2 + $0x78] ss:$12 sps:$4 sm:$0xff]  }
   0x5   :  { %941 = vmatpush3.bf16.msra.mxu1 %v1054_v10  ;;  %v1043_v13 = vld [vmem:[%s1389_s2 + $0x60] ss:$12 sps:$4 sm:$0xff]   ;;  %v1044_v14 = vld [vmem:[%s1389_s2 + $0x7c] ss:$12 sps:$4 sm:$0xff]   ;;  %v1056_v16 = vld [vmem:[%s1389_s2 + $0x38] ss:$12 sps:$4 sm:$0xff]  }
   0x6   :  { %942 = vmatprep.subr.bf16.mxu1 %v1118_v3  ;;  %v1047_v17 = vld [vmem:[%s1389_s2 + $0x94] ss:$12 sps:$4 sm:$0xff]   ;;  %v1057_v18 = vld [vmem:[%s1389_s2 + $0x50] ss:$12 sps:$4 sm:$0xff]   ;;  %v1050_v20 = vld [vmem:[%s1389_s2 + $0xac] ss:$12 sps:$4 sm:$0xff]  }
   0x7   :  { %203 = vmatpush1.bf16.msra.mxu0 %v1034_v5  ;;  %v1049_v19 = vld [vmem:[%s1389_s2 + $0x90] ss:$12 sps:$4 sm:$0xff]   ;;  %v1058_v21 = vld [vmem:[%s1389_s2 + $0x68] ss:$12 sps:$4 sm:$0xff]   ;;  %v1238_v23 = vld [vmem:[%s1387_s0] sm:$0xff]  }
   0x8   :  { %204 = vmatprep.subr.bf16.mxu0 %v1035_v6  ;;  %v1052_v22 = vld [vmem:[%s1389_s2 + $0xa8] ss:$12 sps:$4 sm:$0xff]   ;;  %v1059_v24 = vld [vmem:[%s1389_s2 + $0x80] ss:$12 sps:$4 sm:$0xff]  }
   0x9   :  { %943 = vmatpush3.bf16.msra.mxu1 %v1055_v12 }
   0xa   :  { %944 = vmatprep.subr.bf16.mxu1 %v1118_v3 }
   0xb   :  { %205 = vmatpush1.bf16.msra.mxu0 %v1037_v7 }
   0xc   :  { %206 = vmatprep.subr.bf16.mxu0 %v1038_v8 }
   0xd   :  { %945 = vmatpush3.bf16.msra.mxu1 %v1056_v16 }
   0xe   :  { %946 = vmatprep.subr.bf16.mxu1 %v1118_v3 }
   0xf   :  { %207 = vmatpush1.bf16.msra.mxu0 %v1040_v9 }
  0x10   :  { %208 = vmatprep.subr.bf16.mxu0 %v1041_v11 }
  0x11   :  { %947 = vmatpush3.bf16.msra.mxu1 %v1057_v18 }
  0x12   :  { %948 = vmatprep.subr.bf16.mxu1 %v1118_v3 }
  0x13   :  { %209 = vmatpush1.bf16.msra.mxu0 %v1043_v13 }
  0x14   :  { %210 = vmatprep.subr.bf16.mxu0 %v1044_v14 }
  0x15   :  { %949 = vmatpush3.bf16.msra.mxu1 %v1058_v21 }
  0x17   :  { %211 = vmatpush1.bf16.msra.mxu0 %v1046_v15 }
  0x18   :  { %212 = vmatprep.subr.bf16.mxu0 %v1047_v17 }
  0x1b   :  { %213 = vmatpush1.bf16.msra.mxu0 %v1049_v19 }
  0x1c   :  { %214 = vmatprep.subr.bf16.mxu0 %v1050_v20 }
  0x1d   :  { %13 = vsyncpa [#allocation3], 0  ;;  %950 = vmatprep.subr.bf16.mxu1 %v1118_v3  ;;  %v1060_v25 = vld [vmem:[%s1389_s2 + $0x98] ss:$12 sps:$4 sm:$0xff]   ;;  %v1061_v26 = vld [vmem:[%s1389_s2 + $0xb0] ss:$12 sps:$4 sm:$0xff]   ;;  %v376_v45 = vlaneseq }
  0x1e   :  { %951 = vmatpush3.bf16.msra.mxu1 %v1059_v24  ;;  %vm1119_vm0 = vmmov 0   ;;  %vm441_vm1 = vcmask 1043456   ;;  %v1120_v43 = vmov 1966171168   ;;  %v1277_v49 = vld [vmem:[%s1388_s1] sm:$0x3] }
  0x1f   :  { %215 = vmatpush1.bf16.msra.mxu0 %v1052_v22  ;;  %952 = vmatprep.subr.bf16.mxu1 %v1118_v3  ;;  %v374_v44 = vunpack.c.l.s4 %v1120_v43  ;;  %v1271_v47 = vshrl.u32 %v376_v45, 7  ;;  %vm413_vm5 = vcmask 64512   ;;  %vm682_vm7 = vcmask 58368   ;;  %s1121_s19 = smov [#allocation2]  }
  0x20   :  { %960 = vmatprep.subr.bf16.mxu0 %v1118_v3  ;;  %956 = vmatprep.mubr.msk.bf16.mxu1 %vm1119_vm0, %v1118_v3  ;;  %vm752_vm8 = vcmask 1041409   ;;  %s851_s20 = sshll.u32 %s1121_s19, 4  ;;  %s852_s20 = int_to_ptr.vmem [resolvable:$true] %s851_s20 }
  0x21   :  { %v375_v46 = vunpack.c.0.s8 %v374_v44  ;;  %v1281_v54 = vsub.s32 0, %v1271_v47  ;;  %s1093_s21 = scalar_lea.vmem %s852_s20, 32  ;;  %p1098_p1 = scmp.lt.s32.totalorder %s852_s20, %s852_s20 }
  0x22   :  { %233 = vmatmul.mubr.bf16.vlgmr.msra.gmra.mrb[0].mxu0 %v1238_v23  ;;  %953 = vmatpush3.bf16.msra.mxu1 %v1060_v25  ;;  %v1062_v25 = vld [vmem:[%s1390_s3] sm:$0xff]   ;;  %p1094_p0 = scmp.ne.s32.totalorder %s852_s20, %s1093_s21  ;;  %p1099_p2 = scmp.lt.s32.totalorder %s1093_s21, %s1093_s21 }
  0x23   :  { %954 = vmatprep.subr.bf16.mxu1 %v1118_v3  ;;  %962 = vmatprep.mubr.msk.bf16.mxu0 %vm1119_vm0, %v1118_v3  ;;  %v378_v48 = vsub.s32 %v375_v46, %v1271_v47  ;;  %v637_v46 = vunpack.c.l.bf16 %v1238_v23 }
  0x24   :  { %p1100_p3 = por %p1099_p2, %p1098_p1 }
  0x25   :  { %v379_v50 = vrot.slane %v1277_v49, %v378_v48 }
  0x26   :  { %955 = vmatpush3.bf16.msra.mxu1 %v1061_v26  ;;  %p1101_p4 = pnand %p1100_p3, %p1094_p0 }
  0x27   :  { %966 = vmatprep.subr.bf16.mxu1 %v1118_v3  ;;  %v380_v51 = vcombine.high %v379_v50, %v379_v50  ;;  %v387_v52 = vrot.slane %v379_v50, %v378_v48 }
  0x29   :  { %957 = vmatmul.mubr.bf16.vlgmr.msra.gmra.mrb[0].mxu1 %v1238_v23  ;;  %v394_v53 = vrot.slane %v380_v51, %v378_v48  ;;  %vm397_vm2 = vcmp.gt.f32.partialorder %v387_v52, 0.5  ;;  %v638_v48 = vunpack.c.h.bf16 %v1238_v23  ;;  %v683_v23 = vsel %vm682_vm7, %v1277_v49, 0.0 }
  0x2a   :  { %968 = vmatprep.mubr.msk.bf16.mxu1 %vm1119_vm0, %v1118_v3  ;;  %v399_v55 = vsel %vm397_vm2, 1, %v1117_v2 }
  0x2b   :  { %vm398_vm3 = vcmp.gt.f32.partialorder %v394_v53, 0.5  ;;  %v404_v57 = vrot.slane %v399_v55, %v1281_v54 }
  0x2c   :  { %v400_v56 = vsel %vm398_vm3, 1, %v1117_v2 }
  0x2d   :  { %v408_v58 = vrot.slane %v400_v56, %v1281_v54  ;;  %vm409_vm4 = vcmp.eq.s32.totalorder %v404_v57, 1 }
  0x2f   :  { %vm410_vm6 = vcmp.eq.s32.totalorder %v408_v58, 1 }
  0xf5   :  { %v234_v27 = vpop.f32.mrb[0].mxu0 }
  0xf6   :  { %v236_v28 = vpop.f32.mrb[1].mxu0  ;;  %v284_v33 = vpack.c.bf16 %v234_v27, %v234_v27 }
  0xf7   :  { %v286_v29 = vpack.c.bf16 %v236_v28, %v236_v28  ;;  %v238_v30 = vpop.f32.mrb[2].mxu0 }
  0xf8   :  { %v240_v31 = vpop.f32.mrb[3].mxu0  ;;  %v285_v34 = vpack.c.bf16 %v238_v30, %v238_v30 }
  0xf9   :  { %v287_v32 = vpack.c.bf16 %v240_v31, %v240_v31  ;;  %961 = vmatpush3.bf16.xpose.msra.mxu0 %v286_v29  ;;  %v1063_v29 = vld [vmem:[%s1390_s3 + $0x8] sm:$0xff]   ;;  %v1064_v31 = vld [vmem:[%s1390_s3 + $0x10] sm:$0xff]  }
  0xfa   :  { %972 = vmatprep.subr.bf16.mxu0 %v1118_v3 }
  0xfb   :  { %967 = vmatpush3.bf16.xpose.msra.mxu1 %v287_v32  ;;  %v1065_v32 = vld [vmem:[%s1390_s3 + $0x18] sm:$0xff]  }
  0xfc   :  { %978 = vmatprep.subr.bf16.mxu1 %v1118_v3  ;;  %v277_v35 = vpop.f32.mrb[0].mxu1 }
  0xfd   :  { %v288_v36 = vpack.c.bf16 %v277_v35, %v277_v35  ;;  %v958_v37 = vpop.f32.mrb[1].mxu1  ;;  %v1068_v35 = vld [vmem:[%s1390_s3 + $0x30] sm:$0xff]  }
  0xfe   :  { %v280_v38 = vpop.f32.mrb[2].mxu1 }
  0xff   :  { %v443_v39 = vsel %vm441_vm1, %v288_v36, 0  ;;  %v289_v40 = vpack.c.bf16 %v280_v38, %v280_v38  ;;  %v959_v41 = vpop.f32.mrb[3].mxu1  ;;  %v1069_v36 = vld [vmem:[%s1390_s3 + $0x38] sm:$0xff]  }
 0x100   :  { %963 = vmatmul.mubr.bf16.vlgmr.msra.gmra.mrb[4].mxu0 %v284_v33  ;;  %v1066_v33 = vld [vmem:[%s1390_s3 + $0x20] sm:$0xff]  }
 0x101   :  { %974 = vmatprep.mubr.msk.bf16.mxu0 %vm1119_vm0, %v1118_v3  ;;  %973 = vmatpush3.bf16.msra.mxu0 %v443_v39  ;;  %v489_v42 = vsel %vm441_vm1, %v289_v40, 0 }
 0x102   :  { %969 = vmatmul.mubr.bf16.vlgmr.msra.gmra.mrb[4].mxu1 %v285_v34  ;;  %984 = vmatprep.subr.bf16.mxu0 %v1118_v3  ;;  %v1067_v34 = vld [vmem:[%s1390_s3 + $0x28] sm:$0xff]  }
 0x103   :  { %980 = vmatprep.mubr.msk.bf16.mxu1 %vm1119_vm0, %v1118_v3  ;;  %979 = vmatpush3.bf16.msra.mxu1 %v489_v42 }
 0x104   :  { %1004 = vmatprep.subr.bf16.mxu1 %v1118_v3 }
 0x1d3   :  { %v324_v59 = vpop.f32.mrb[4].mxu0 }
 0x1d4   :  { %v370_v60 = vmul.f32 0.088388346, %v324_v59  ;;  %v964_v61 = vpop.f32.mrb[5].mxu0 }
 0x1d5   :  { %v327_v62 = vpop.f32.mrb[6].mxu0  ;;  %v364_v63 = vpop.f32.mrb[4].mxu1 }
 0x1d6   :  { %v371_v0 = vmul.f32 0.088388346, %v364_v63  ;;  %v965_v1 = vpop.f32.mrb[7].mxu0  ;;  %v970_v4 = vpop.f32.mrb[5].mxu1  ;;  %v411_v5 = vsel %vm409_vm4, %v370_v60, -1e+30 }
 0x1d7   :  { %v367_v6 = vpop.f32.mrb[6].mxu1  ;;  %v414_v7 = vsel %vm413_vm5, %v411_v5, -inf  ;;  %v696_v1 = vsub.s32 1, %v1271_v47  ;;  %v1072_v47 = vld [vmem:[%s1393_s6 + $0x10] sm:$0xff]  }
 0x1d8   :  { %415 = vmax.xlane.f32.xlu0 %v414_v7  ;;  %v971_v2 = vpop.f32.mrb[7].mxu1  ;;  %v412_v8 = vsel %vm410_vm6, %v371_v0, -1e+30  ;;  %v690_v6 = vrot.slane %v1277_v49, %v1281_v54  ;;  %v1071_v7 = vld [vmem:[%s1393_s6 + $0x8] sm:$0xff]   ;;  %v1074_v54 = vld [vmem:[%s1393_s6 + $0x20] sm:$0xff]  }
 0x1d9   :  { %v417_v9 = vsel %vm413_vm5, %v412_v8, -inf  ;;  %v697_v4 = vrot.slane %v1277_v49, %v696_v1  ;;  %v1073_v49 = vld [vmem:[%s1393_s6 + $0x18] sm:$0xff]   ;;  %v1075_v2 = vld [vmem:[%s1393_s6 + $0x28] sm:$0xff]  }
 0x1dc   :  { %418 = vmax.xlane.f32.xlu0 %v417_v9  ;;  %v1077_v9 = vld [vmem:[%s1393_s6 + $0x38] sm:$0xff]  }
 0x265   :  { %v416_v10 = vpop.xlane.xlu0 %415 }
 0x266   :  { %v420_v11 = vsub.f32 %v411_v5, %v416_v10  ;;  %v1070_v5 = vld [vmem:[%s1393_s6] sm:$0xff]  }
 0x268   :  { %v422_v12 = vmul.f32 1.442695, %v420_v11 }
 0x269   :  { %v419_v13 = vpop.xlane.xlu0 %418 }
 0x26a   :  { %1079 = vpow2.f32 %v422_v12  ;;  %v421_v14 = vsub.f32 %v412_v8, %v419_v13  ;;  %v1076_v8 = vld [vmem:[%s1393_s6 + $0x30] sm:$0xff]  }
 0x26c   :  { %v424_v15 = vmul.f32 1.442695, %v421_v14 }
 0x26e   :  { %1081 = vpow2.f32 %v424_v15 }
 0x274   :  { %v1080_v16 = vpop.eup %1079 }
 0x275   :  { %v426_v17 = vsel %vm413_vm5, %v1080_v16, 0.0 }
 0x276   :  { %427 = vadd.xlane.f32.xlu1 %v426_v17 }
 0x278   :  { %v1082_v18 = vpop.eup %1081 }
 0x279   :  { %v429_v19 = vsel %vm413_vm5, %v1082_v18, 0.0 }
 0x27a   :  { %430 = vadd.xlane.f32.xlu1 %v429_v19 }
 0x303   :  { %v428_v20 = vpop.xlane.xlu1 %427 }
 0x304   :  { %1083 = vrcp.f32 %v428_v20 }
 0x307   :  { %v431_v21 = vpop.xlane.xlu1 %430 }
 0x308   :  { %1085 = vrcp.f32 %v431_v21  ;;  %v895_v21 = vld [vmem:[%s1392_s5] ss:$0 sm:$0xff] }
 0x30e   :  { %v1084_v22 = vpop.eup %1083 }
 0x30f   :  { %v434_v24 = vmul.f32 %v1084_v22, %v1080_v16 }
 0x311   :  { %v436_v26 = vpack.c.bf16 %v434_v24, %v434_v24 }
 0x312   :  { %v1086_v27 = vpop.eup %1085 }
 0x313   :  { %v435_v28 = vmul.f32 %v1086_v27, %v1082_v18  ;;  %975 = vmatmul.mubr.msk.bf16.vlgmr.msra.gmra.mrb[8].mxu0 %vm413_vm5, %v436_v26  ;;  %v894_v18 = vld [vmem:[%s1391_s4] ss:$0 sm:$0xff] }
 0x314   :  { %985 = vmatpush3.bf16.msra.mxu0 %v1062_v25  ;;  %1000 = vmatprep.mubr.msk.bf16.mxu0 %vm1119_vm0, %v1118_v3 }
 0x315   :  { %v437_v30 = vpack.c.bf16 %v435_v28, %v435_v28  ;;  %986 = vmatprep.subr.bf16.mxu0 %v1118_v3 }
 0x317   :  { %981 = vmatmul.mubr.msk.bf16.vlgmr.msra.gmra.mrb[8].mxu1 %vm413_vm5, %v437_v30 }
 0x318   :  { %987 = vmatpush3.bf16.msra.mxu0 %v1063_v29  ;;  %1020 = vmatprep.mubr.msk.bf16.mxu1 %vm1119_vm0, %v1118_v3 }
 0x319   :  { %988 = vmatprep.subr.bf16.mxu0 %v1118_v3  ;;  %1005 = vmatpush3.bf16.msra.mxu1 %v1070_v5 }
 0x31a   :  { %1006 = vmatprep.subr.bf16.mxu1 %v1118_v3 }
 0x31c   :  { %989 = vmatpush3.bf16.msra.mxu0 %v1064_v31 }
 0x31d   :  { %990 = vmatprep.subr.bf16.mxu0 %v1118_v3  ;;  %1007 = vmatpush3.bf16.msra.mxu1 %v1071_v7 }
 0x31e   :  { %1008 = vmatprep.subr.bf16.mxu1 %v1118_v3 }
 0x320   :  { %991 = vmatpush3.bf16.msra.mxu0 %v1065_v32 }
 0x321   :  { %992 = vmatprep.subr.bf16.mxu0 %v1118_v3  ;;  %1009 = vmatpush3.bf16.msra.mxu1 %v1072_v47 }
 0x322   :  { %1010 = vmatprep.subr.bf16.mxu1 %v1118_v3 }
 0x324   :  { %993 = vmatpush3.bf16.msra.mxu0 %v1066_v33 }
 0x325   :  { %994 = vmatprep.subr.bf16.mxu0 %v1118_v3  ;;  %1011 = vmatpush3.bf16.msra.mxu1 %v1073_v49 }
 0x326   :  { %1012 = vmatprep.subr.bf16.mxu1 %v1118_v3 }
 0x328   :  { %995 = vmatpush3.bf16.msra.mxu0 %v1067_v34 }
 0x329   :  { %996 = vmatprep.subr.bf16.mxu0 %v1118_v3  ;;  %1013 = vmatpush3.bf16.msra.mxu1 %v1074_v54 }
 0x32a   :  { %1014 = vmatprep.subr.bf16.mxu1 %v1118_v3 }
 0x32c   :  { %997 = vmatpush3.bf16.msra.mxu0 %v1068_v35 }
 0x32d   :  { %998 = vmatprep.subr.bf16.mxu0 %v1118_v3  ;;  %1015 = vmatpush3.bf16.msra.mxu1 %v1075_v2 }
 0x32e   :  { %1016 = vmatprep.subr.bf16.mxu1 %v1118_v3 }
 0x330   :  { %999 = vmatpush3.bf16.msra.mxu0 %v1069_v36 }
 0x331   :  { %1017 = vmatpush3.bf16.msra.mxu1 %v1076_v8 }
 0x332   :  { %1018 = vmatprep.subr.bf16.mxu1 %v1118_v3 }
 0x335   :  { %1019 = vmatpush3.bf16.msra.mxu1 %v1077_v9 }
 0x3e6   :  { %v479_v37 = vpop.f32.mrb[8].mxu0 }
 0x3e7   :  { %v976_v38 = vpop.f32.mrb[9].mxu0 }
 0x3e8   :  { %v482_v39 = vpop.f32.mrb[10].mxu0 }
 0x3e9   :  { %v977_v40 = vpop.f32.mrb[11].mxu0 }
 0x3ea   :  { %v525_v41 = vpop.f32.mrb[8].mxu1 }
 0x3eb   :  { %v531_v42 = vpack.c.bf16 %v525_v41, %v479_v37  ;;  %v982_v43 = vpop.f32.mrb[9].mxu1 }
 0x3ec   :  { %v528_v44 = vpop.f32.mrb[10].mxu1 }
 0x3ed   :  { %v983_v45 = vpop.f32.mrb[11].mxu1  ;;  %1001 = vmatmul.mubr.bf16.vlgmr.msra.gmra.mrb[12].mxu0 %v531_v42 }
 0x4c0   :  { %v630_v50 = vpop.f32.mrb[12].mxu0 }
 0x4c1   :  { %v639_v51 = vadd.f32 %v637_v46, %v630_v50  ;;  %v1002_v52 = vpop.f32.mrb[13].mxu0 }
 0x4c2   :  { %v633_v53 = vpop.f32.mrb[14].mxu0 }
 0x4c3   :  { %v640_v55 = vadd.f32 %v638_v48, %v633_v53  ;;  %641 = vadd.xlane.f32.xlu1 %v639_v51  ;;  %v1003_v56 = vpop.f32.mrb[15].mxu0 }
 0x4c5   :  { %643 = vadd.xlane.f32.xlu0 %v640_v55 }
 0x550   :  { %v642_v57 = vpop.xlane.xlu1 %641 }
 0x551   :  { %v646_v58 = vmul.f32 0.0078125, %v642_v57 }
 0x552   :  { %v644_v59 = vpop.xlane.xlu0 %643 }
 0x553   :  { %v648_v60 = vsub.f32 %v639_v51, %v646_v58  ;;  %v647_v61 = vmul.f32 0.0078125, %v644_v59  ;;  %v896_v58 = vld [vmem:[%s1394_s7] ss:$0 sm:$0xff] }
 0x555   :  { %v649_v62 = vsub.f32 %v640_v55, %v647_v61  ;;  %v650_v63 = vmul.f32 %v648_v60, %v648_v60 }
 0x557   :  { %652 = vadd.xlane.f32.xlu1 %v650_v63  ;;  %v651_v0 = vmul.f32 %v649_v62, %v649_v62 }
 0x559   :  { %654 = vadd.xlane.f32.xlu0 %v651_v0 }
 0x55d   :  { %684 = vadd.xlane.f32.xlu0 %v683_v23 }
 0x568   :  { %699 = vbcast.lane.b32.xlu1 %v697_v4, 256 }
 0x573   :  { %692 = vbcast.lane.b32.xlu0 %v690_v6, 256 }
 0x5e4   :  { %v653_v10 = vpop.xlane.xlu1 %652 }
 0x5e5   :  { %v656_v11 = vmul.f32 0.0078125, %v653_v10 }
 0x5e6   :  { %v655_v12 = vpop.xlane.xlu0 %654 }
 0x5e7   :  { %v658_v13 = vadd.f32 1e-12, %v656_v11  ;;  %v657_v14 = vmul.f32 0.0078125, %v655_v12 }
 0x5e8   :  { %v700_v28 = vpop.permute.xlu1 %699 }
 0x5e9   :  { %1087 = vrsqrt.f32 %v658_v13  ;;  %v659_v15 = vadd.f32 1e-12, %v657_v14 }
 0x5ea   :  { %v685_v16 = vpop.xlane.xlu0 %684 }
 0x5eb   :  { %1089 = vrsqrt.f32 %v659_v15  ;;  %v686_v20 = vmax.f32 %v685_v16, 1.0 }
 0x5ed   :  { %1091 = vrcp.f32 %v686_v20 }
 0x5ee   :  { %v693_v25 = vpop.permute.xlu0 %692 }
 0x5f3   :  { %v1088_v17 = vpop.eup %1087 }
 0x5f4   :  { %v662_v3 = vmul.f32 %v1088_v17, %v648_v60 }
 0x5f5   :  { %v1090_v19 = vpop.eup %1089 }
 0x5f6   :  { %v671_v22 = vmul.f32 %v894_v18, %v662_v3  ;;  %v663_v24 = vmul.f32 %v1090_v19, %v649_v62 }
 0x5f7   :  { %v1092_v39 = vpop.eup %1091 }
 0x5f8   :  { %v680_v26 = vadd.f32 %v895_v21, %v671_v22  ;;  %v672_v27 = vmul.f32 %v894_v18, %v663_v24  ;;  %v717_v44 = vrot.slane %v1092_v39, 1 }
 0x5fa   :  { %v701_v29 = vmul.f32 %v693_v25, %v680_v26  ;;  %v681_v30 = vadd.f32 %v895_v21, %v672_v27 }
 0x5fc   :  { %v703_v31 = vrot.slane %v701_v29, 4  ;;  %v702_v32 = vmul.f32 %v700_v28, %v681_v30 }
 0x5fe   :  { %v704_v33 = vadd.f32 %v703_v31, %v701_v29  ;;  %v709_v34 = vrot.slane %v702_v32, 4 }
 0x600   :  { %v705_v35 = vrot.slane %v704_v33, 2  ;;  %v710_v36 = vadd.f32 %v709_v34, %v702_v32 }
 0x602   :  { %v706_v37 = vadd.f32 %v705_v35, %v704_v33  ;;  %v711_v38 = vrot.slane %v710_v36, 2 }
 0x604   :  { %v707_v40 = vrot.slane %v706_v37, 1  ;;  %v712_v41 = vadd.f32 %v711_v38, %v710_v36 }
 0x606   :  { %v708_v42 = vadd.f32 %v707_v40, %v706_v37  ;;  %v713_v43 = vrot.slane %v712_v41, 1 }
 0x608   :  { %v720_v45 = vmul.f32 %v1092_v39, %v708_v42  ;;  %v714_v46 = vadd.f32 %v713_v43, %v712_v41 }
 0x60a   :  { %v721_v48 = vmul.f32 %v717_v44, %v714_v46  ;;  %v722_v50 = vpack.c.bf16 %v720_v45, %v720_v45 }
 0x60c   :  { %v723_v51 = vpack.c.bf16 %v721_v48, %v721_v48  ;;  %v749_v53 = vunpack.c.l.b16 %v722_v50 }
 0x60e   :  { %v750_v52 = vunpack.c.l.b16 %v723_v51 }
 0x610   :  { %v751_v55 = vrot.slane %v750_v52, 7 }
 0x612   :  { %v753_v56 = vsel %vm752_vm8, %v751_v55, %v749_v53 }
 0x613   :  { %v754_v57 = vpack.c.b16 %v753_v56, %v753_v56 }
 0x615   :  { %1021 = vmatmul.mubr.bf16.vlgmr.msra.gmra.mrb[12].mxu1 %v754_v57 }
 0x6e8   :  { %v838_v59 = vpop.f32.mrb[12].mxu1 }
 0x6e9   :  { %v839_v60 = vadd.f32 %v896_v58, %v838_v59  ;;  %v1022_v61 = vpop.f32.mrb[13].mxu1 }
 0x6ea   :  { %v841_v62 = vpop.f32.mrb[14].mxu1 }
 0x6eb   :  { %844 = vst [vmem:[#allocation2] sm:$0x3] %v839_v60  ;;  %v1023_v63 = vpop.f32.mrb[15].mxu1 }
 0x6ec   :  { %1104 = shalt.err (!%p1101_p4)
}
 0x6ed   :  { %s1105_s7 = scalar_lea.hbm %s1395_s8, 32 }
 0x6ee   :  { %p1106_p5 = scmp.ne.s32.totalorder %s1395_s8, %s1105_s7  ;;  %p1109_p6 = scmp.lt.u32.totalorder %s1105_s7, %s1395_s8 }
 0x6f0   :  { %p1111_p7 = pnand %p1109_p6, %p1106_p5 }
 0x6f2   :  { %1114 = shalt.err (!%p1111_p7)
}
 0x6f3   :  { %854 = dma.vmem_to_hbm [thread:$0]  %s852_s20, 32, %s1395_s8, [#allocation3]  }
 0x6f4   :  { %1115 = dma.done.wait [#allocation3], 32  }
 0x6f5   :  { %1116 = vsyncadd [#allocation3], 4294967264 }
 0x6f6   :  { %858 = vsyncpa [#allocation3], 1 }

// kernel: model_bert_only_forward.2
= control target key start
LH: loop header
LB: loop body
LE: loop exit
PB: predicated region body
PF: predicated region fallthrough
CT: control target
= control target key end

     0   :  { %s1150_s18 = smov 0   ;;  %s1152_s19 = smov 0   ;;  %s1286_s0 = inlined_call_operand.vmem [shape: bf16[2,64,32], index: 0, kind: input, shape index: {}]   ;;  %s1287_s1 = inlined_call_operand.vmem [shape: bf16[32,32], index: 1, kind: input, shape index: {}]   ;;  %s1288_s2 = inlined_call_operand.vmem [shape: f32[1,32], index: 2, kind: input, shape index: {}]   ;;  %s1289_s3 = inlined_call_operand.vmem [shape: bf16[32,1280], index: 3, kind: input, shape index: {}]   ;;  %s1290_s4 = inlined_call_operand.vmem [shape: f32[1,1280], index: 4, kind: input, shape index: {}]   ;;  %s1291_s5 = inlined_call_operand.vmem [shape: f32[2,1,1280], index: 5, kind: output, shape index: {}]  }
   0x1   :  { %s1154_s20 = smov 0  }
   0x2 LB: > { %s27_s21 = sadd.s32 1, %s1111_s19  ;;  %p969_p0 = scmp.ge.s32.totalorder %s1115_s20, 1  ;;  %s1115_s20 = sphi %s1154_s20, %s15_s20   ;;  %s1111_s19 = sphi %s1152_s19, %s1293_s19   ;;  %s1107_s18 = sphi %s1150_s18, %s1292_s18  }
   0x3   : > { %p29_p1 = scmp.ge.s32.totalorder %s27_s21, 2  ;;  %p206_p2 = scmp.lt.s32.totalorder %s1115_s20, 3 }
   0x5   : > { %s1295_s21 = smov (%p29_p1, %s27_s21), 0  ;;  %p207_p3 = pnand %p969_p0, %p206_p2 }
   0x6   : > { %v1057_v0 = vld [vmem:[%s1287_s1] sm:$0xff] (!%p207_p3)   ;;  %p238_p4 = scmp.lt.s32.totalorder (!%p207_p3), %s1107_s18, 1  ;;  %v1058_v1 = vld [vmem:[%s1287_s1 + $0x8] sm:$0xff] (!%p207_p3)   ;;  %vm309_vm0 = vcmask (!%p207_p3), 261120   ;;  %vm256_vm1 = vcmask (!%p207_p3), 253952   ;;  %v1117_v6 = vmov (!%p207_p3), 0.0  }
   0x7   : > { %210 = sbr.rel (%p207_p3) target bundleno = 523 (0x20b), region = 40  ;;  %1017 = vmatprep.subr.bf16.mxu0 (!%p207_p3), %v1057_v0  ;;  %257 = vst.msk [vmem:[#allocation2] sm:$0x1] (!%p207_p3), %vm256_vm1, %v1117_v6  ;;  %v1063_v7 = vld [vmem:[%s1289_s3 + $0x4] ss:$40 sps:$4 sm:$0xff] (!%p207_p3)   ;;  %v1118_v16 = vmov (!%p207_p3), 0  }
   0x8   : > { %1018 = vmatpush3.bf16.msra.mxu0 (!%p207_p3), %v1057_v0  ;;  %v1065_v8 = vld [vmem:[%s1289_s3] ss:$40 sps:$4 sm:$0xff] (!%p207_p3)   ;;  %v1066_v9 = vld [vmem:[%s1289_s3 + $0x10] ss:$40 sps:$4 sm:$0xff] (!%p207_p3)   ;;  %v1068_v10 = vld [vmem:[%s1289_s3 + $0x14] ss:$40 sps:$4 sm:$0xff] (!%p207_p3)   ;;  %611 = vmatprep.subr.bf16.mxu1 (!%p207_p3), %v1063_v7 }
   0x9   : > { %1019 = vmatprep.subr.bf16.mxu0 (!%p207_p3), %v1058_v1  ;;  %v1069_v11 = vld [vmem:[%s1289_s3 + $0x54] ss:$40 sps:$4 sm:$0xff] (!%p207_p3)   ;;  %v1074_v12 = vld [vmem:[%s1289_s3 + $0x64] ss:$40 sps:$4 sm:$0xff] (!%p207_p3)   ;;  %612 = vmatpush1.bf16.msra.mxu1 (!%p207_p3), %v1065_v8  ;;  %v1071_v13 = vld [vmem:[%s1289_s3 + $0x50] ss:$40 sps:$4 sm:$0xff] (!%p207_p3)  }
   0xa   : > { %613 = vmatprep.subr.bf16.mxu1 (!%p207_p3), %v1069_v11  ;;  %v1072_v14 = vld [vmem:[%s1289_s3 + $0x60] ss:$40 sps:$4 sm:$0xff] (!%p207_p3)   ;;  %v1077_v15 = vld [vmem:[%s1289_s3 + $0xc] ss:$40 sps:$4 sm:$0xff] (!%p207_p3)   ;;  %643 = vmatprep.mubr.bf16.mxu1 (!%p207_p3), %v1118_v16 }
   0xb   : > { %v1080_v17 = vld [vmem:[%s1289_s3 + $0x24] ss:$40 sps:$4 sm:$0xff] (!%p207_p3)   ;;  %v972_v18 = vld [vmem:[%s1288_s2] ss:$0 sm:$0xff] (!%p207_p3) }
   0xc   : > { %1020 = vmatpush3.bf16.msra.mxu0 (!%p207_p3), %v1058_v1 }
   0xd   : > { %693 = vmatprep.subr.bf16.mxu0 (!%p207_p3), %v1068_v10  ;;  %614 = vmatpush1.bf16.msra.mxu1 (!%p207_p3), %v1071_v13  ;;  %v1078_v13 = vld [vmem:[%s1289_s3 + $0x20] ss:$40 sps:$4 sm:$0xff] (!%p207_p3)  }
   0xe   : > { %s1297_s18 = smov (!%p238_p4, %s1107_s18), 1  ;;  %652 = vmatprep.subr.bf16.mxu1 %v1077_v15  ;;  %v403_v7 = vld [vmem:[#allocation2] sm:$0x1]  ;;  %v1083_v15 = vld [vmem:[%s1289_s3 + $0x5c] ss:$40 sps:$4 sm:$0xff]  }
   0xf   : > { %s1010_s26 = sshll.u32 %s1297_s18, 5  ;;  %s1029_s9 = smul.u32 10, %s1297_s18 }
  0x10   : > { %s245_s29 = scalar_lea.vmem %s1286_s0, %s1010_s26 }
  0x11   : > { %v1059_v2 = vld [vmem:[%s245_s29] sm:$0xff]   ;;  %v1060_v3 = vld [vmem:[%s245_s29 + $0x8] sm:$0xff]   ;;  %v1061_v4 = vld [vmem:[%s245_s29 + $0x10] sm:$0xff]   ;;  %s250_s12 = scalar_lea.vmem %s1291_s5, %s1029_s9 }
  0x12   : > { %1021 = vmatprep.mubr.msk.bf16.mxu0 %vm309_vm0, %v1059_v2  ;;  %v1062_v5 = vld [vmem:[%s245_s29 + $0x18] sm:$0xff]  }
  0x13   : > { %1022 = vmatmul.mubr.msk.bf16.vlgmr.msra.gmra.mrb[0].mxu0 %vm309_vm0, %v1060_v3 }
  0x14   : > { %1025 = vmatprep.mubr.msk.bf16.mxu0 %vm309_vm0, %v1061_v4  ;;  %694 = vmatpush1.bf16.msra.mxu0 %v1066_v9 }
  0x15   : > { %695 = vmatprep.subr.bf16.mxu0 %v1074_v12  ;;  %v1075_v12 = vld [vmem:[%s1289_s3 + $0x8] ss:$40 sps:$4 sm:$0xff]  }
  0x18   : > { %696 = vmatpush1.bf16.msra.mxu0 %v1072_v14 }
  0x19   : > { %775 = vmatprep.subr.bf16.mxu0 %v1080_v17  ;;  %v1086_v17 = vld [vmem:[%s1289_s3 + $0x74] ss:$40 sps:$4 sm:$0xff]  }
  0x1b   : > { %1026 = vmatmul.mubr.msk.bf16.gmra.mrb[4].mxu0 %vm309_vm0, %v1062_v5 }
  0x1c   : > { %725 = vmatprep.mubr.bf16.mxu0 %v1118_v16 }
  0xe6   : > { %v1023_v19 = vpop.f32.mrb[0].mxu0 }
  0xe7   : > { %v365_v20 = vadd.f32 %v1023_v19, %v972_v18  ;;  %v356_v21 = vpop.f32.mrb[1].mxu0  ;;  %v1084_v19 = vld [vmem:[%s1289_s3 + $0x70] ss:$40 sps:$4 sm:$0xff]  }
  0xe8   : > { %v357_v22 = vadd.f32 %v972_v18, %v356_v21  ;;  %v1024_v23 = vpop.f32.mrb[2].mxu0  ;;  %v1087_v21 = vld [vmem:[%s1289_s3 + $0x18] ss:$40 sps:$4 sm:$0xff]  }
  0xe9   : > { %v368_v24 = vadd.f32 %v1024_v23, %v972_v18  ;;  %v359_v25 = vpop.f32.mrb[3].mxu0  ;;  %v389_v26 = vmax.f32 %v365_v20, 0.0  ;;  %v1089_v20 = vld [vmem:[%s1289_s3 + $0x1c] ss:$40 sps:$4 sm:$0xff]   ;;  %v1090_v23 = vld [vmem:[%s1289_s3 + $0x68] ss:$40 sps:$4 sm:$0xff]  }
  0xea   : > { %v387_v27 = vmax.f32 %v357_v22, 0.0  ;;  %v360_v28 = vadd.f32 %v972_v18, %v359_v25  ;;  %v1092_v22 = vld [vmem:[%s1289_s3 + $0x6c] ss:$40 sps:$4 sm:$0xff]  }
  0xeb   : > { %v390_v30 = vmax.f32 %v368_v24, 0.0  ;;  %v397_v32 = vmin.f32 %v389_v26, 6.0  ;;  %v558_v24 = vlaneseq }
  0xec   : > { %v395_v29 = vmin.f32 %v387_v27, 6.0  ;;  %v388_v31 = vmax.f32 %v360_v28, 0.0  ;;  %v454_v28 = vld [vmem:[%s1290_s4] sm:$0xff] }
  0xed   : > { %v398_v38 = vmin.f32 %v390_v30, 6.0  ;;  %v407_v45 = vsel %vm309_vm0, %v397_v32, 0.0  ;;  %v559_v25 = vshrl.u32 %v558_v24, 7  ;;  %vm895_vm2 = vcmp.lt.s32.totalorder %v558_v24, 256 }
  0xee   : > { %v396_v33 = vmin.f32 %v388_v31, 6.0  ;;  %v1027_v34 = vpop.f32.mrb[4].mxu0  ;;  %v404_v37 = vsel %vm309_vm0, %v395_v29, 0.0 }
  0xef   : > { %v381_v35 = vadd.f32 %v1027_v34, %v972_v18  ;;  %v372_v36 = vpop.f32.mrb[5].mxu0  ;;  %v409_v50 = vsel %vm309_vm0, %v398_v38, 0.0  ;;  %v560_v26 = vsub.s32 0, %v559_v25  ;;  %v576_v27 = vsub.s32 4, %v559_v25 }
  0xf0   : > { %v405_v39 = vsel %vm309_vm0, %v396_v33, 0.0  ;;  %v373_v40 = vadd.f32 %v972_v18, %v372_v36  ;;  %v1028_v41 = vpop.f32.mrb[6].mxu0  ;;  %v564_v29 = vsub.s32 1, %v559_v25  ;;  %v580_v30 = vsub.s32 5, %v559_v25 }
  0xf1   : > { %v406_v42 = vadd.f32 %v405_v39, %v404_v37  ;;  %v384_v43 = vadd.f32 %v1028_v41, %v972_v18  ;;  %v375_v44 = vpop.f32.mrb[7].mxu0  ;;  %v393_v46 = vmax.f32 %v381_v35, 0.0  ;;  %v561_v31 = vrot.slane %v454_v28, %v560_v26 }
  0xf2   : > { %v391_v47 = vmax.f32 %v373_v40, 0.0  ;;  %v376_v48 = vadd.f32 %v972_v18, %v375_v44  ;;  %v1081_v18 = vld [vmem:[%s1289_s3 + $0x58] ss:$40 sps:$4 sm:$0xff]   ;;  %v577_v32 = vrot.slane %v454_v28, %v576_v27  ;;  %v565_v33 = vrot.slane %v454_v28, %v564_v29 }
  0xf3   : > { %v408_v49 = vadd.f32 %v407_v45, %v406_v42  ;;  %v394_v52 = vmax.f32 %v384_v43, 0.0  ;;  %v401_v55 = vmin.f32 %v393_v46, 6.0  ;;  %v581_v34 = vrot.slane %v454_v28, %v580_v30 }
  0xf4   : > { %v399_v51 = vmin.f32 %v391_v47, 6.0  ;;  %v392_v53 = vmax.f32 %v376_v48, 0.0  ;;  %v568_v40 = vsub.s32 2, %v559_v25  ;;  %v1119_v42 = vmov 1966171168  }
  0xf5   : > { %v410_v54 = vadd.f32 %v409_v50, %v408_v49  ;;  %v402_v59 = vmin.f32 %v394_v52, 6.0  ;;  %v415_v62 = vsel %vm309_vm0, %v401_v55, 0.0  ;;  %v831_v43 = vunpack.c.l.s4 %v1119_v42  ;;  %v455_v47 = vld [vmem:[%s1290_s4 + $0x8] sm:$0x3] }
  0xf6   : > { %v411_v56 = vsel %vm309_vm0, %v399_v51, 0.0  ;;  %v400_v57 = vmin.f32 %v392_v53, 6.0  ;;  %v572_v48 = vsub.s32 3, %v559_v25  ;;  %v569_v53 = vrot.slane %v454_v28, %v568_v40 }
  0xf7   : > { %v412_v58 = vadd.f32 %v411_v56, %v410_v54  ;;  %v417_v0 = vsel %vm309_vm0, %v402_v59, 0.0  ;;  %v593_v54 = vrot.slane %v455_v47, %v560_v26  ;;  %v832_v55 = vunpack.c.0.s8 %v831_v43 }
  0xf8   : > { %v413_v60 = vsel %vm309_vm0, %v400_v57, 0.0  ;;  %v573_v56 = vrot.slane %v454_v28, %v572_v48  ;;  %v597_v57 = vrot.slane %v455_v47, %v564_v29 }
  0xf9   : > { %v414_v61 = vadd.f32 %v413_v60, %v412_v58 }
  0xfb   : > { %v416_v63 = vadd.f32 %v415_v62, %v414_v61 }
  0xfd   : > { %v418_v1 = vadd.f32 %v417_v0, %v416_v63  ;;  %v584_v0 = vsub.s32 6, %v559_v25 }
  0xff   : > { %v419_v2 = vrot.slane %v418_v1, 4 }
 0x101   : > { %v420_v3 = vadd.f32 %v419_v2, %v418_v1  ;;  %v835_v1 = vsub.s32 %v832_v55, %v559_v25 }
 0x103   : > { %v421_v4 = vrot.slane %v420_v3, 2 }
 0x105   : > { %v422_v5 = vadd.f32 %v421_v4, %v420_v3 }
 0x107   : > { %v423_v6 = vrot.slane %v422_v5, 1 }
 0x109   : > { %v424_v8 = vadd.f32 %v423_v6, %v422_v5  ;;  %v588_v6 = vsub.s32 7, %v559_v25 }
 0x10b   : > { %v425_v9 = vadd.f32 %v424_v8, %v403_v7 }
 0x10d   : > { %427 = vst.msk [vmem:[#allocation2] sm:$0x1] %vm256_vm1, %v425_v9 }
 0x114   : > { %v431_v10 = vld [vmem:[#allocation2] sm:$0x1] }
 0x115   : > { %v432_v11 = vmul.f32 0.015625, %v431_v10 }
 0x117   : > { %v433_v14 = vpack.c.bf16 %v432_v11, %v432_v11  ;;  %v585_v11 = vrot.slane %v454_v28, %v584_v0 }
 0x119   : > { %1003 = vmatmul.mubr.msk.bf16.vlgmr.msra.gmra.mrb[0].mxu1 %vm309_vm0, %v433_v14  ;;  %1005 = vmatmul.mubr.msk.bf16.vlgmr.msra.gmra.mrb[8].mxu0 %vm309_vm0, %v433_v14 }
 0x11a   : > { %653 = vmatpush1.bf16.msra.mxu1 %v1075_v12  ;;  %776 = vmatpush1.bf16.msra.mxu0 %v1078_v13 }
 0x11b   : > { %654 = vmatprep.subr.bf16.mxu1 %v1083_v15  ;;  %777 = vmatprep.subr.bf16.mxu0 %v1086_v17  ;;  %v589_v15 = vrot.slane %v454_v28, %v588_v6 }
 0x11c   : > { %684 = vmatprep.mubr.bf16.mxu1 %v1118_v16  ;;  %807 = vmatprep.mubr.bf16.mxu0 %v1118_v16 }
 0x11e   : > { %655 = vmatpush1.bf16.msra.mxu1 %v1081_v18  ;;  %778 = vmatpush1.bf16.msra.mxu0 %v1084_v19 }
 0x11f   : > { %734 = vmatprep.subr.bf16.mxu1 %v1089_v20 }
 0x121   : > { %1004 = vmatmul.mubr.msk.bf16.vlgmr.msra.gmra.mrb[4].mxu1 %vm309_vm0, %v433_v14  ;;  %1007 = vmatmul.mubr.msk.bf16.vlgmr.msra.gmra.mrb[12].mxu0 %vm309_vm0, %v433_v14 }
 0x122   : > { %735 = vmatpush1.bf16.msra.mxu1 %v1087_v21  ;;  %766 = vmatprep.mubr.bf16.mxu1 %v1118_v16 }
 0x123   : > { %736 = vmatprep.subr.bf16.mxu1 %v1092_v22 }
 0x126   : > { %737 = vmatpush1.bf16.msra.mxu1 %v1090_v23 }
 0x129   : > { %1006 = vmatmul.mubr.msk.bf16.vlgmr.msra.gmra.mrb[8].mxu1 %vm309_vm0, %v433_v14 }
 0x1ec   : > { %v645_v35 = vpop.f32.mrb[0].mxu1  ;;  %v727_v16 = vpop.f32.mrb[8].mxu0 }
 0x1ed   : > { %v646_v36 = vadd.f32 %v645_v35, %v561_v31  ;;  %v728_v37 = vadd.f32 %v727_v16, %v577_v32  ;;  %v647_v38 = vpop.f32.mrb[1].mxu1  ;;  %v729_v39 = vpop.f32.mrb[9].mxu0 }
 0x1ee   : > { %v648_v41 = vadd.f32 %v647_v38, %v565_v33  ;;  %v730_v44 = vadd.f32 %v729_v39, %v581_v34  ;;  %v649_v45 = vpop.f32.mrb[2].mxu1  ;;  %v731_v46 = vpop.f32.mrb[10].mxu0 }
 0x1ef   : > { %v650_v49 = vpop.f32.mrb[3].mxu1  ;;  %v732_v50 = vpop.f32.mrb[11].mxu0 }
 0x1f0   : > { %v826_v51 = vcombine.low %v646_v36, %v648_v41  ;;  %v828_v52 = vcombine.low %v728_v37, %v730_v44 }
 0x1f2   : > { %v836_v12 = vrot.slane %v826_v51, %v835_v1  ;;  %v850_v27 = vrot.slane %v828_v52, %v835_v1 }
 0x1f4   : > { %v686_v58 = vpop.f32.mrb[4].mxu1  ;;  %v809_v59 = vpop.f32.mrb[12].mxu0 }
 0x1f5   : > { %v687_v60 = vadd.f32 %v686_v58, %v569_v53  ;;  %v810_v61 = vadd.f32 %v809_v59, %v593_v54  ;;  %v688_v62 = vpop.f32.mrb[5].mxu1  ;;  %v811_v63 = vpop.f32.mrb[13].mxu0 }
 0x1f6   : > { %v689_v2 = vadd.f32 %v688_v62, %v573_v56  ;;  %v812_v3 = vadd.f32 %v811_v63, %v597_v57  ;;  %v690_v4 = vpop.f32.mrb[6].mxu1  ;;  %v813_v5 = vpop.f32.mrb[14].mxu0 }
 0x1f7   : > { %v691_v7 = vpop.f32.mrb[7].mxu1  ;;  %v814_v8 = vpop.f32.mrb[15].mxu0 }
 0x1f8   : > { %v827_v9 = vcombine.low %v687_v60, %v689_v2  ;;  %v875_v10 = vcombine.low %v810_v61, %v812_v3 }
 0x1fa   : > { %v843_v13 = vrot.slane %v827_v9, %v835_v1  ;;  %v882_v14 = vrot.slane %v875_v10, %v835_v1 }
 0x1fc   : > { %v858_v17 = vcombine.low %v836_v12, %v843_v13  ;;  %v889_v18 = vrot.slane %v882_v14, %v835_v1  ;;  %v768_v19 = vpop.f32.mrb[8].mxu1 }
 0x1fd   : > { %v769_v20 = vadd.f32 %v768_v19, %v585_v11  ;;  %v770_v21 = vpop.f32.mrb[9].mxu1 }
 0x1fe   : > { %897 = vst.msk [vmem:[%s250_s12 + $0x8] sm:$0x3] %vm895_vm2, %v889_v18  ;;  %v771_v22 = vadd.f32 %v770_v21, %v589_v15  ;;  %v772_v23 = vpop.f32.mrb[10].mxu1  ;;  %v866_v31 = vrot.slane %v858_v17, %v835_v1 }
 0x1ff   : > { %v773_v25 = vpop.f32.mrb[11].mxu1 }
 0x200   : > { %v829_v26 = vcombine.low %v769_v20, %v771_v22 }
 0x202   : > { %v857_v29 = vrot.slane %v829_v26, %v835_v1 }
 0x204   : > { %v859_v30 = vcombine.low %v850_v27, %v857_v29 }
 0x206   : > { %v873_v28 = vrot.slane %v859_v30, %v835_v1 }
 0x208   : > { %v874_v32 = vcombine.low %v866_v31, %v873_v28 }
 0x20a   : > { %892 = vst [vmem:[%s250_s12] sm:$0xff] %v874_v32 }
 0x20b PF: > { %s15_s20 = sadd.s32 1, %s1115_s20   ;;  %s1292_s18 = smov %s1111_s19 }
 0x20c   : > { %p12_p5 = scmp.ge.s32.totalorder %s15_s20, 4   ;;  %s1293_s19 = smov %s1295_s21 }
 0x20e   :  { %14 = sbr.rel (!%p12_p5) target bundleno = 2 (0x2), region = 78 }

</bundles_post_ra>
